<compile_context>
chip_gen: v6e
topology: v6e:2x2x1
jax: 0.10.0
libtpu: 0.0.40
codegen_flags: <defaults>
</compile_context>

<pallas_src>
import jax
import jax.numpy as jnp
from jax.experimental import pallas as pl
from jax.experimental.pallas import tpu as pltpu

SUBLANE = 8  # sublane height of a vreg (second-to-last dim granularity)


def _round_up(n, m):
    return ((n + m - 1) // m) * m


def _batch_tiling(B, tile_b):
    """Adaptive batch tile: minimal padding, >=2 tiles when splittable."""
    n_tiles = max(1, pl.cdiv(B, tile_b))
    # Prefer >= 2 tiles when the batch can be split: v7x shards the
    # "parallel" batch axis across its 2 TensorCores.  The extra grid step
    # costs ~0.35us on single-TC v5e/v6e, which is negligible.
    if n_tiles < 2 and B >= 2 * SUBLANE:
        n_tiles = 2
    tb = _round_up(pl.cdiv(B, n_tiles), SUBLANE)
    n_tiles = pl.cdiv(B, tb)
    return tb, tb * n_tiles, n_tiles


def mlp_kernel(x_ref, w1_ref, b1_ref, w2_ref, b2_ref, w3_ref, b3_ref, out_ref):
    """Fused MLP on one (TB, S) batch tile.

    x_ref:  (TB, S)   states (f32 or bf16)
    w*_ref: (in, out) unpadded weights (y = x @ W + b layout)
    b*_ref: (1, out)  unpadded biases
    out_ref:(TB, A)   Q-values, f32
    """
    f32 = jnp.float32

    h1 = jnp.dot(x_ref[...], w1_ref[...], preferred_element_type=f32)
    h1 = jnp.maximum(h1 + b1_ref[...].astype(f32), 0.0)

    h2 = jnp.dot(h1.astype(w2_ref.dtype), w2_ref[...], preferred_element_type=f32)
    h2 = jnp.maximum(h2 + b2_ref[...].astype(f32), 0.0)

    out = jnp.dot(h2.astype(w3_ref.dtype), w3_ref[...], preferred_element_type=f32)
    out_ref[...] = (out + b3_ref[...].astype(f32)).astype(out_ref.dtype)


def net_forward(x, params, *, tile_b=1024):
    """Pallas forward pass for the DQN Net.

    x: (B, state_dim), params: dict from init_params (unpadded weights).
    Returns (B, action_dim) float32 Q-values.
    """
    B, S = x.shape
    w1, b1 = params["w1"], params["b1"]
    w2, b2 = params["w2"], params["b2"]
    w3, b3 = params["w3"], params["b3"]
    assert w1.shape[0] == S, (w1.shape, S)
    H = w1.shape[1]
    A = w3.shape[1]

    # bf16 weights (v6e/v7x path) -> cast x to match; MXU accumulates in f32.
    compute_dtype = w1.dtype
    x = x.astype(compute_dtype)

    TB, B_pad, n_tiles = _batch_tiling(B, tile_b)
    if B_pad != B:
        # Only (B_pad - B) < TB junk rows of width S=8; no lane padding.
        x = jnp.pad(x, ((0, B_pad - B), (0, 0)))

    # Block last dims equal the full array dims (S, H, A), which is legal;
    # the batch tile TB is a multiple of 8 sublanes.
    x_spec = pl.BlockSpec((TB, S), lambda i: (i, 0))
    w1_spec = pl.BlockSpec((S, H), lambda i: (0, 0))   # VMEM-resident (constant
    w2_spec = pl.BlockSpec((H, H), lambda i: (0, 0))   # block index -> DMA'd once)
    w3_spec = pl.BlockSpec((H, A), lambda i: (0, 0))
    b1_spec = pl.BlockSpec((1, H), lambda i: (0, 0))
    b2_spec = pl.BlockSpec((1, H), lambda i: (0, 0))
    b3_spec = pl.BlockSpec((1, A), lambda i: (0, 0))
    out_spec = pl.BlockSpec((TB, A), lambda i: (i, 0))  # narrow output: A real lanes only

    out_pad = pl.pallas_call(
        mlp_kernel,
        out_shape=jax.ShapeDtypeStruct((B_pad, A), jnp.float32),
        grid_spec=pl.GridSpec(
            grid=(n_tiles,),
            in_specs=[x_spec, w1_spec, b1_spec, w2_spec, b2_spec, w3_spec, b3_spec],
            out_specs=out_spec,
        ),
        compiler_params=pltpu.CompilerParams(
            dimension_semantics=("parallel",),  # v7x: shard batch over 2 TCs
        ),
    )(x, w1, b1, w2, b2, w3, b3)

    return out_pad if B_pad == B else out_pad[:B]


def init_params(key, state_dim=8, action_dim=4, hidden_dim=32, dtype=jnp.float32):
    """Deterministic init mimicking nn.Linear default (uniform +/- 1/sqrt(fan_in)).

    Weights are stored transposed vs PyTorch ((in, out), so y = x @ W + b) and
    UNPADDED -- the kernel works directly on the natural sizes.
    """
    keys = jax.random.split(key, 6)

    def linear(kw, kb, fan_in, fan_out):
        bound = 1.0 / jnp.sqrt(float(fan_in))
        w = jax.random.uniform(kw, (fan_in, fan_out), jnp.float32, -bound, bound)
        b = jax.random.uniform(kb, (1, fan_out), jnp.float32, -bound, bound)
        return w.astype(dtype), b.astype(dtype)

    w1, b1 = linear(keys[0], keys[1], state_dim, hidden_dim)
    w2, b2 = linear(keys[2], keys[3], hidden_dim, hidden_dim)
    w3, b3 = linear(keys[4], keys[5], hidden_dim, action_dim)

    return {
        "w1": w1, "b1": b1, "w2": w2, "b2": b2, "w3": w3, "b3": b3,
        "state_dim": state_dim, "action_dim": action_dim, "hidden_dim": hidden_dim,
    }


def cast_params(params, dtype):
    """Cast only the array leaves (e.g. to bfloat16 for v6e/v7x)."""
    out = dict(params)
    for k in ("w1", "b1", "w2", "b2", "w3", "b3"):
        out[k] = params[k].astype(dtype)
    return out


def net_forward_ref(x, p):
    """Pure-JAX reference (f32 math), matching nn.Linear semantics."""
    f32 = jnp.float32
    w1, b1 = p["w1"].astype(f32), p["b1"].astype(f32)
    w2, b2 = p["w2"].astype(f32), p["b2"].astype(f32)
    w3, b3 = p["w3"].astype(f32), p["b3"].astype(f32)
    h1 = jnp.maximum(x.astype(f32) @ w1 + b1, 0.0)
    h2 = jnp.maximum(h1 @ w2 + b2, 0.0)
    return h2 @ w3 + b3


if __name__ == "__main__":
    key = jax.random.PRNGKey(0)
    k_params, k_x, k_x2 = jax.random.split(key, 3)

    state_dim, action_dim, hidden_dim = 8, 4, 32
    params = init_params(k_params, state_dim, action_dim, hidden_dim)

    # Small shape consistent with the module's default usage (inference path).
    batch = 2
    x = jax.random.normal(k_x, (batch, state_dim), dtype=jnp.float32)
    out = jax.block_until_ready(net_forward(x, params))
    ref = net_forward_ref(x, params)
    assert out.shape == (batch, action_dim), out.shape
    assert jnp.allclose(out, ref, atol=1e-5, rtol=1e-5), "mismatch vs reference (small)"

    # Replay-batch-sized run exercising the adaptive batch grid (B=300 -> TB=152, 2 tiles).
    big_batch = 300
    x_big = jax.random.normal(k_x2, (big_batch, state_dim), dtype=jnp.float32)
    out_big = jax.block_until_ready(net_forward(x_big, params))
    ref_big = net_forward_ref(x_big, params)
    assert out_big.shape == (big_batch, action_dim), out_big.shape
    assert jnp.allclose(out_big, ref_big, atol=1e-5, rtol=1e-5), "mismatch vs reference (big)"

    # bf16-operand path (v6e/v7x): half the HBM bytes, f32 MXU accumulation.
    params_bf16 = cast_params(params, jnp.bfloat16)
    out_bf16 = jax.block_until_ready(net_forward(x_big, params_bf16))
    ref_bf16 = net_forward_ref(x_big, params_bf16)  # same (rounded) weights, f32 math
    assert out_bf16.shape == (big_batch, action_dim), out_bf16.shape
    assert jnp.allclose(out_bf16, ref_bf16, atol=2e-2, rtol=2e-2), "mismatch vs reference (bf16)"

    print("KERNEL_OK")
</pallas_src>

<mosaic_0001>
module attributes {stable_mosaic.version = 11 : i64} {
  func.func @mlp_kernel(%arg0: i32, %arg1: memref<8x8xf32, #tpu.memory_space<vmem>>, %arg2: memref<8x32xf32, #tpu.memory_space<vmem>>, %arg3: memref<1x32xf32, #tpu.memory_space<vmem>>, %arg4: memref<32x32xf32, #tpu.memory_space<vmem>>, %arg5: memref<1x32xf32, #tpu.memory_space<vmem>>, %arg6: memref<32x4xf32, #tpu.memory_space<vmem>>, %arg7: memref<1x4xf32, #tpu.memory_space<vmem>>, %arg8: memref<8x4xf32, #tpu.memory_space<vmem>>) attributes {dimension_semantics = [#tpu.dimension_semantics<parallel>], iteration_bounds = array<i64: 1>, scalar_prefetch = 0 : i64, scratch_operands = 0 : i64, tpu.core_type = #tpu.core_type<tc>, window_params = [{transform_indices = @transform_0, window_bounds = array<i64: 8, 8>}, {pipeline_mode = #tpu.pipeline_mode<synchronous>, transform_indices = @transform_1, window_bounds = array<i64: 8, 32>}, {pipeline_mode = #tpu.pipeline_mode<synchronous>, transform_indices = @transform_2, window_bounds = array<i64: 1, 32>}, {pipeline_mode = #tpu.pipeline_mode<synchronous>, transform_indices = @transform_3, window_bounds = array<i64: 32, 32>}, {pipeline_mode = #tpu.pipeline_mode<synchronous>, transform_indices = @transform_4, window_bounds = array<i64: 1, 32>}, {pipeline_mode = #tpu.pipeline_mode<synchronous>, transform_indices = @transform_5, window_bounds = array<i64: 32, 4>}, {pipeline_mode = #tpu.pipeline_mode<synchronous>, transform_indices = @transform_6, window_bounds = array<i64: 1, 4>}, {transform_indices = @transform_7, window_bounds = array<i64: 8, 4>}]} {
    %c0 = arith.constant 0 : index
    %c0_0 = arith.constant 0 : index
    %0 = vector.load %arg1[%c0, %c0_0] : memref<8x8xf32, #tpu.memory_space<vmem>>, vector<8x8xf32>
    %c0_1 = arith.constant 0 : index
    %c0_2 = arith.constant 0 : index
    %1 = vector.load %arg2[%c0_1, %c0_2] : memref<8x32xf32, #tpu.memory_space<vmem>>, vector<8x32xf32>
    %cst = arith.constant dense<0.000000e+00> : vector<8x32xf32>
    %2 = tpu.matmul %0, %1, %cst {dimension_numbers = #tpu.dot_dimension_numbers<[1], [0], [0], [1], [0, 0, 1, 1], [], []>} : vector<8x8xf32>, vector<8x32xf32>, vector<8x32xf32> -> vector<8x32xf32>
    %c0_3 = arith.constant 0 : index
    %c0_4 = arith.constant 0 : index
    %3 = vector.load %arg3[%c0_3, %c0_4] : memref<1x32xf32, #tpu.memory_space<vmem>>, vector<1x32xf32>
    %4 = vector.broadcast %3 : vector<1x32xf32> to vector<8x32xf32>
    %5 = arith.addf %2, %4 : vector<8x32xf32>
    %cst_5 = arith.constant 0.000000e+00 : f32
    %6 = vector.broadcast %cst_5 : f32 to vector<8x32xf32>
    %7 = arith.maximumf %5, %6 : vector<8x32xf32>
    %c0_6 = arith.constant 0 : index
    %c0_7 = arith.constant 0 : index
    %8 = vector.load %arg4[%c0_6, %c0_7] : memref<32x32xf32, #tpu.memory_space<vmem>>, vector<32x32xf32>
    %cst_8 = arith.constant dense<0.000000e+00> : vector<8x32xf32>
    %9 = tpu.matmul %7, %8, %cst_8 {dimension_numbers = #tpu.dot_dimension_numbers<[1], [0], [0], [1], [0, 0, 1, 1], [], []>} : vector<8x32xf32>, vector<32x32xf32>, vector<8x32xf32> -> vector<8x32xf32>
    %c0_9 = arith.constant 0 : index
    %c0_10 = arith.constant 0 : index
    %10 = vector.load %arg5[%c0_9, %c0_10] : memref<1x32xf32, #tpu.memory_space<vmem>>, vector<1x32xf32>
    %11 = vector.broadcast %10 : vector<1x32xf32> to vector<8x32xf32>
    %12 = arith.addf %9, %11 : vector<8x32xf32>
    %cst_11 = arith.constant 0.000000e+00 : f32
    %13 = vector.broadcast %cst_11 : f32 to vector<8x32xf32>
    %14 = arith.maximumf %12, %13 : vector<8x32xf32>
    %c0_12 = arith.constant 0 : index
    %c0_13 = arith.constant 0 : index
    %15 = vector.load %arg6[%c0_12, %c0_13] : memref<32x4xf32, #tpu.memory_space<vmem>>, vector<32x4xf32>
    %cst_14 = arith.constant dense<0.000000e+00> : vector<8x4xf32>
    %16 = tpu.matmul %14, %15, %cst_14 {dimension_numbers = #tpu.dot_dimension_numbers<[1], [0], [0], [1], [0, 0, 1, 1], [], []>} : vector<8x32xf32>, vector<32x4xf32>, vector<8x4xf32> -> vector<8x4xf32>
    %c0_15 = arith.constant 0 : index
    %c0_16 = arith.constant 0 : index
    %17 = vector.load %arg7[%c0_15, %c0_16] : memref<1x4xf32, #tpu.memory_space<vmem>>, vector<1x4xf32>
    %18 = vector.broadcast %17 : vector<1x4xf32> to vector<8x4xf32>
    %19 = arith.addf %16, %18 : vector<8x4xf32>
    %c0_17 = arith.constant 0 : index
    %c0_18 = arith.constant 0 : index
    %20 = vector.load %arg8[%c0_17, %c0_18] : memref<8x4xf32, #tpu.memory_space<vmem>>, vector<8x4xf32>
    tpu.vector_store %arg8[%c0_17, %c0_18], %19 {strides = array<i32>} : memref<8x4xf32, #tpu.memory_space<vmem>>, vector<8x4xf32>,
    return
  }
  func.func @transform_0(%arg0: i32) -> (i32, i32) {
    %c0_i32 = arith.constant 0 : i32
    %c0_i32_0 = arith.constant 0 : i32
    return %arg0, %c0_i32 : i32, i32
  }
  func.func @transform_1(%arg0: i32) -> (i32, i32) {
    %c0_i32 = arith.constant 0 : i32
    %c0_i32_0 = arith.constant 0 : i32
    %c0_i32_1 = arith.constant 0 : i32
    return %c0_i32, %c0_i32_0 : i32, i32
  }
  func.func @transform_2(%arg0: i32) -> (i32, i32) {
    %c0_i32 = arith.constant 0 : i32
    %c0_i32_0 = arith.constant 0 : i32
    %c0_i32_1 = arith.constant 0 : i32
    return %c0_i32, %c0_i32_0 : i32, i32
  }
  func.func @transform_3(%arg0: i32) -> (i32, i32) {
    %c0_i32 = arith.constant 0 : i32
    %c0_i32_0 = arith.constant 0 : i32
    %c0_i32_1 = arith.constant 0 : i32
    return %c0_i32, %c0_i32_0 : i32, i32
  }
  func.func @transform_4(%arg0: i32) -> (i32, i32) {
    %c0_i32 = arith.constant 0 : i32
    %c0_i32_0 = arith.constant 0 : i32
    %c0_i32_1 = arith.constant 0 : i32
    return %c0_i32, %c0_i32_0 : i32, i32
  }
  func.func @transform_5(%arg0: i32) -> (i32, i32) {
    %c0_i32 = arith.constant 0 : i32
    %c0_i32_0 = arith.constant 0 : i32
    %c0_i32_1 = arith.constant 0 : i32
    return %c0_i32, %c0_i32_0 : i32, i32
  }
  func.func @transform_6(%arg0: i32) -> (i32, i32) {
    %c0_i32 = arith.constant 0 : i32
    %c0_i32_0 = arith.constant 0 : i32
    %c0_i32_1 = arith.constant 0 : i32
    return %c0_i32, %c0_i32_0 : i32, i32
  }
  func.func @transform_7(%arg0: i32) -> (i32, i32) {
    %c0_i32 = arith.constant 0 : i32
    %c0_i32_0 = arith.constant 0 : i32
    return %arg0, %c0_i32 : i32, i32
  }
}

</mosaic_0001>

<bundles_post_ra>
// kernel: tpu_custom_call.1
= control target key start
LH: loop header
LB: loop body
LE: loop exit
PB: predicated region body
PF: predicated region fallthrough
CT: control target
= control target key end

     0   :  { %12 = vsyncpa [#allocation3], 0  ;;  %s493_s0 = inlined_call_operand.vmem [shape: f32[8,8], index: 0, kind: input, shape index: {}]   ;;  %s494_s1 = inlined_call_operand.hbm [shape: f32[8,32], index: 1, kind: input, shape index: {}]   ;;  %s495_s2 = inlined_call_operand.vmem [shape: f32[1,32], index: 2, kind: input, shape index: {}]   ;;  %s496_s3 = inlined_call_operand.vmem [shape: f32[32,32], index: 3, kind: input, shape index: {}]   ;;  %s497_s4 = inlined_call_operand.hbm [shape: f32[1,32], index: 4, kind: input, shape index: {}]   ;;  %s498_s5 = inlined_call_operand.vmem [shape: f32[32,4], index: 5, kind: input, shape index: {}]   ;;  %s499_s6 = inlined_call_operand.vmem [shape: f32[1,4], index: 6, kind: input, shape index: {}]   ;;  %s500_s7 = inlined_call_operand.vmem [shape: f32[8,4], index: 7, kind: output, shape index: {}]  }
   0x1   :  { %13 = vsyncpa [#allocation5], 0  ;;  %s405_s24 = smov [#allocation2]   ;;  %s406_s26 = smov [#allocation4]  }
   0x2   :  { %s22_s25 = sshll.u32 %s405_s24, 4  ;;  %s36_s27 = sshll.u32 %s406_s26, 4  ;;  %s23_s25 = int_to_ptr.vmem [resolvable:$true] %s22_s25  ;;  %s37_s27 = int_to_ptr.vmem [resolvable:$true] %s36_s27 }
   0x3   :  { %s369_s28 = scalar_lea.vmem %s23_s25, 128  ;;  %p374_p1 = scmp.lt.s32.totalorder %s23_s25, %s23_s25 }
   0x4   :  { %p370_p0 = scmp.ne.s32.totalorder %s23_s25, %s369_s28  ;;  %p375_p2 = scmp.lt.s32.totalorder %s369_s28, %s369_s28 }
   0x6   :  { %p376_p3 = por %p375_p2, %p374_p1 }
   0x8   :  { %p377_p4 = pnand %p376_p3, %p370_p0 }
   0xa   :  { %380 = shalt.err (!%p377_p4)
}
   0xb   :  { %25 = dma.hbm_to_vmem [thread:$0]  %s494_s1, 128, %s23_s25, [#allocation3]  }
   0xc   :  { %s389_s8 = scalar_lea.vmem %s37_s27, 16  ;;  %s393_s9 = scalar_lea.vmem %s37_s27, 32 }
   0xd   :  { %p390_p5 = scmp.ne.s32.totalorder %s37_s27, %s389_s8  ;;  %p394_p6 = scmp.lt.s32.totalorder %s37_s27, %s37_s27 }
   0xe   :  { %p395_p7 = scmp.lt.s32.totalorder %s393_s9, %s389_s8 }
  0x10   :  { %p396_p8 = por %p395_p7, %p394_p6 }
  0x12   :  { %p397_p9 = pnand %p396_p8, %p390_p5 }
  0x14   :  { %400 = shalt.err (!%p397_p9)
}
  0x15   :  { %39 = dma.hbm_to_vmem [thread:$0]  %s497_s4, 16, %s37_s27, [#allocation5]  }
  0x16   :  { %401 = dma.done.wait [#allocation3], 128  }
  0x17   :  { %402 = vsyncadd [#allocation3], 4294967168 }
  0x18   :  { %403 = dma.done.wait [#allocation5], 16  }
  0x19   :  { %404 = vsyncadd [#allocation5], 4294967280  ;;  %v407_v0 = vmov 0.0   ;;  %vm408_vm0 = vmmov 0   ;;  %vm59_vm1 = vcmask 64512   ;;  %v51_v1 = vld [vmem:[#allocation2] sm:$0xff] }
  0x1a   :  { %330 = vmatprep.subr.mxu0 %v407_v0  ;;  %332 = vmatprep.mubr.msk.f32.mxu0 %vm408_vm0, %v407_v0  ;;  %v50_v2 = vld [vmem:[%s493_s0] sm:$0xff]  ;;  %v137_v3 = vld [vmem:[%s496_s3 + $0x18] sm:$0xff]  ;;  %v136_v4 = vld [vmem:[%s496_s3 + $0x10] sm:$0xff]  ;;  %vm145_vm2 = vcmask 261120   ;;  %vm304_vm3 = vcmask 31744  }
  0x1b   :  { %335 = vmatprep.subr.mxu1 %v407_v0  ;;  %343 = vmatprep.mubr.msk.f32.mxu1 %vm408_vm0, %v407_v0  ;;  %v135_v5 = vld [vmem:[%s496_s3 + $0x8] sm:$0xff]  ;;  %v134_v6 = vld [vmem:[%s496_s3] sm:$0xff]  ;;  %v223_v7 = vld [vmem:[%s498_s5 + $0x18] sm:$0xff] }
  0x1c   :  { %331 = vmatpush3.msra.mxu0 %v51_v1  ;;  %336 = vmatpush3.msra.mxu1 %v137_v3  ;;  %v312_v8 = vld [vmem:[%s495_s2] ss:$0 sm:$0xff]  ;;  %v222_v13 = vld [vmem:[%s498_s5 + $0x10] sm:$0xff]  ;;  %v221_v14 = vld [vmem:[%s498_s5 + $0x8] sm:$0xff] }
  0x1d   :  { %333 = vmatmul.mubr.msk.f32.vlgmr.msra.gmra.mxu0 %vm59_vm1, %v50_v2  ;;  %337 = vmatprep.subr.mxu1 %v407_v0  ;;  %v220_v15 = vld [vmem:[%s498_s5] sm:$0xff]  ;;  %v314_v16 = vld [vmem:[#allocation4] ss:$0 sm:$0xff] }
  0x1e   :  { %346 = vmatprep.subr.mxu0 %v407_v0  ;;  %354 = vmatprep.mubr.msk.f32.mxu0 %vm408_vm0, %v407_v0  ;;  %v316_v21 = vld [vmem:[%s499_s6] ss:$0 sm:$0xff] }
  0x1f   :  { %338 = vmatpush3.msra.mxu1 %v136_v4  ;;  %347 = vmatpush3.msra.mxu0 %v223_v7 }
  0x20   :  { %339 = vmatprep.subr.mxu1 %v407_v0  ;;  %348 = vmatprep.subr.mxu0 %v407_v0 }
  0x21   :  { %340 = vmatpush3.msra.mxu1 %v135_v5  ;;  %349 = vmatpush3.msra.mxu0 %v222_v13 }
  0x22   :  { %341 = vmatprep.subr.mxu1 %v407_v0  ;;  %350 = vmatprep.subr.mxu0 %v407_v0 }
  0x23   :  { %342 = vmatpush3.msra.mxu1 %v134_v6  ;;  %351 = vmatpush3.msra.mxu0 %v221_v14 }
  0x24   :  { %352 = vmatprep.subr.mxu0 %v407_v0 }
  0x25   :  { %353 = vmatpush3.msra.mxu0 %v220_v15 }
  0xdd   :  { %v129_v9 = vpop.f32.mrf.mxu0 }
  0xde   :  { %v130_v10 = vadd.f32 %v312_v8, %v129_v9 }
  0xdf   :  { %v334_v11 = vpop.f32.mrf.mxu0 }
  0xe0   :  { %v133_v12 = vmax.f32 %v130_v10, 0.0 }
  0xe2   :  { %344 = vmatmul.mubr.msk.f32.vlgmr.msra.gmra.mxu1 %vm145_vm2, %v133_v12 }
 0x1a2   :  { %v215_v17 = vpop.f32.mrf.mxu1 }
 0x1a3   :  { %v216_v18 = vadd.f32 %v314_v16, %v215_v17 }
 0x1a4   :  { %v345_v19 = vpop.f32.mrf.mxu1 }
 0x1a5   :  { %v219_v20 = vmax.f32 %v216_v18, 0.0 }
 0x1a7   :  { %355 = vmatmul.mubr.msk.f32.vlgmr.msra.gmra.mxu0 %vm145_vm2, %v219_v20 }
 0x267   :  { %v300_v22 = vpop.f32.mrf.mxu0 }
 0x268   :  { %v301_v23 = vadd.f32 %v316_v21, %v300_v22 }
 0x269   :  { %v356_v24 = vpop.f32.mrf.mxu0 }
 0x26a   :  { %305 = vst.msk [vmem:[%s500_s7] sm:$0xff] %vm304_vm3, %v301_v23 }
 0x26b   :  { %310 = vsyncpa [#allocation3], 1 }
 0x26c   :  { %311 = vsyncpa [#allocation5], 1 }

</bundles_post_ra>
